<compile_context>
chip_gen: v7x
topology: tpu7x:2x2x1
jax: 0.10.0
libtpu: 0.0.40
codegen_flags: <defaults>
</compile_context>

<pallas_src>
import jax
import jax.numpy as jnp
from jax.experimental import pallas as pl
from jax.experimental.pallas import tpu as pltpu


# --------------------------------------------------------------------------- #
# Kernel
# --------------------------------------------------------------------------- #
def okriging_kernel(x_ref, adj_ref, scale_ref, o_ref):
    # x_ref     : VMEM [TM, N]   bf16 row tile of flattened [B*T, N]
    # adj_ref   : VMEM [N, TN]   bf16 un-normalized adjacency column slab
    # scale_ref : VMEM [1, TN]   f32 per-column scale = theta_gate / (sum_adj + 1e-9)
    # o_ref     : VMEM [TM, TN]  output tile
    acc = jnp.dot(x_ref[...], adj_ref[...], preferred_element_type=jnp.float32)
    o_ref[...] = (acc * scale_ref[...]).astype(o_ref.dtype)


# --------------------------------------------------------------------------- #
# Sizing helpers
# --------------------------------------------------------------------------- #
_VMEM_FALLBACK = 64 * 1024 * 1024  # v7x per-TensorCore VMEM (most restrictive gen)


def _round_up(x, m):
    return (x + m - 1) // m * m


def _vmem_budget_and_limit():
    """Generation-aware VMEM sizing (128 MiB on v5e/v6e, 64 MiB on v7x)."""
    try:
        cap = int(pltpu.get_tpu_info().vmem_capacity_bytes)
    except Exception:
        cap = 0
    if cap < 16 * 1024 * 1024:
        cap = _VMEM_FALLBACK
    budget = int(cap * 0.60)   # for pipeline buffers (headroom for Mosaic scratch)
    limit = int(cap * 0.80)    # vmem_limit_bytes handed to the compiler
    return budget, limit


def _choose_tiles(m, n, in_bytes, out_bytes, budget, tm_max=1024):
    """Pick (tm, tn, adj_resident): row tile for x/out, column tile for adj/out."""
    m_cap = _round_up(max(m, 8), 8)  # never tile wider than the data

    def _pick_tm(avail, tn):
        per_row = 2 * n * in_bytes + 2 * tn * out_bytes   # dbl-buffered x + out rows
        tm = int(avail // max(per_row, 1))
        tm = min(tm, tm_max, m_cap)
        if tm >= 256:
            tm = (tm // 256) * 256       # match 256x256 MXU feed / big DMAs
        else:
            tm = max((tm // 8) * 8, 8)
        return tm

    # Path 1: whole (n, n) adjacency resident in VMEM, single-buffered.
    adj_bytes = n * n * in_bytes
    if adj_bytes <= budget // 2:
        return _pick_tm(budget - adj_bytes, n), n, True

    # Path 2: adjacency streamed as (n, tn) column slabs on an outer grid axis;
    # the row tile stays large instead of collapsing toward 8.
    tm = min(256, m_cap, tm_max)
    tm = max((tm // 8) * 8, 8)
    while tm > 8 and 2 * tm * n * in_bytes > budget // 2:
        tm = max(((tm // 2) // 8) * 8, 8)
    denom = 2 * n * in_bytes + 2 * tm * out_bytes
    tn = int((budget - 2 * tm * n * in_bytes) // max(denom, 1))
    tn = max((tn // 128) * 128, 128)
    tn = min(tn, _round_up(n, 128))
    return tm, tn, False


# --------------------------------------------------------------------------- #
# Forward wrapper
# --------------------------------------------------------------------------- #
def okriging_forward(X, adj, theta1, *,
                     compute_dtype=jnp.bfloat16,
                     out_dtype=jnp.float32):
    """X: [B, T, N, C]; adj: [N, N] (2-D adjacency path); theta1: [order]."""
    if isinstance(adj, (list, tuple)):
        adj = adj[0]
    adj = jnp.asarray(adj, dtype=jnp.float32)
    if adj.ndim != 2:
        # TODO(synk): batched 3-D adjacency branch (per-batch sum_adj[i, :]) not implemented.
        raise NotImplementedError("only the 2-D adjacency path is implemented")

    B, T, N, C = X.shape
    M = B * T

    # Single fused producer (slice + reshape + cast) -- one pass over X under jit.
    x2d = X[..., 0].reshape(M, N).astype(compute_dtype)
    adj_c = adj.astype(compute_dtype)                     # un-normalized bf16

    # f32 per-column scale applied to the f32 accumulator inside the kernel:
    # theta gate (round(Theta1) > 0 ? r : r + 1) folded with 1/(column_sums + 1e-9).
    theta1 = jnp.asarray(theta1, dtype=jnp.float32)
    sum_adj = jnp.sum(adj, axis=-2)                       # [N]
    r = jnp.round(theta1)
    factor = jnp.where(r > 0, r, r + 1.0)                 # [order]; broadcasts (order==1 or N)
    scale = (factor / (sum_adj + 1e-9)).reshape(1, N).astype(jnp.float32)

    in_bytes = jnp.dtype(compute_dtype).itemsize
    out_bytes = jnp.dtype(out_dtype).itemsize
    budget, vmem_limit = _vmem_budget_and_limit()
    tm, tn, adj_resident = _choose_tiles(M, N, in_bytes, out_bytes, budget)

    grid = (pl.cdiv(N, tn), pl.cdiv(M, tm))               # column axis outermost

    def _call(single_buffer_adj):
        if single_buffer_adj:
            adj_spec = pl.BlockSpec((N, tn), lambda j, i: (0, j),
                                    pipeline_mode=pl.Buffered(1))
        else:
            adj_spec = pl.BlockSpec((N, tn), lambda j, i: (0, j))
        return pl.pallas_call(
            okriging_kernel,
            out_shape=jax.ShapeDtypeStruct((M, N), out_dtype),
            grid=grid,
            in_specs=[
                pl.BlockSpec((tm, N), lambda j, i: (i, 0)),   # x row tile (unpadded)
                adj_spec,                                     # adj column slab
                pl.BlockSpec((1, tn), lambda j, i: (0, j)),   # f32 scale row
            ],
            out_specs=pl.BlockSpec((tm, tn), lambda j, i: (i, j)),
            compiler_params=pltpu.CompilerParams(
                # TODO(synk): verify the row axis actually shards across v7x's two
                # TensorCores; if not, switch to CORE_PARALLEL / pl.core_map.
                dimension_semantics=("parallel", "parallel"),
                vmem_limit_bytes=vmem_limit,
            ),
        )(x2d, adj_c, scale)

    if adj_resident:
        # Constant block index -> adjacency is DMA'd once; a single buffer halves
        # its VMEM footprint (matters for large N inside v7x's 64 MiB).
        try:
            out2d = _call(True)
        except Exception:
            # pl.Buffered(1) unsupported on this jax/libtpu -> default 2-deep pipeline.
            out2d = _call(False)
    else:
        out2d = _call(False)

    return [out2d.reshape(B, T, N)]


# --------------------------------------------------------------------------- #
# Demo / correctness check
# --------------------------------------------------------------------------- #
if __name__ == "__main__":
    key = jax.random.PRNGKey(0)
    kx, ka = jax.random.split(key)

    B, T, N, C = 2, 8, 16, 4
    X = jax.random.normal(kx, (B, T, N, C), dtype=jnp.float32)
    # Strictly positive adjacency weights so column sums are well-conditioned.
    adj = jax.random.uniform(ka, (N, N), dtype=jnp.float32, minval=0.1, maxval=1.0)
    # nn.Parameter(torch.ones(order)) with order = 1 (deterministic init).
    theta1 = jnp.ones((1,), dtype=jnp.float32)

    out = okriging_forward(X, adj, theta1)
    out = jax.block_until_ready(out)

    # Pure-JAX faithful f32 reference of the PyTorch forward pass.
    x2d_ref = X[:, :, :, 0]
    sum_adj_ref = adj.sum(axis=-2)
    x_adj_ref = jnp.matmul(x2d_ref, adj) / (sum_adj_ref + 1e-9)
    r = jnp.round(theta1)
    ref = jnp.where(r > 0, x_adj_ref * r, x_adj_ref * (r + 1.0))

    # Tight same-precision reference: bf16 operands, f32 accumulation, f32 scale.
    factor_ref = jnp.where(r > 0, r, r + 1.0)
    scale_ref = factor_ref / (sum_adj_ref + 1e-9)
    tight = jnp.matmul(x2d_ref.reshape(B * T, N).astype(jnp.bfloat16),
                       adj.astype(jnp.bfloat16),
                       preferred_element_type=jnp.float32) * scale_ref[None, :]

    assert isinstance(out, list) and len(out) == 1
    assert out[0].shape == (B, T, N)
    assert out[0].dtype == jnp.float32
    assert jnp.allclose(out[0].reshape(B * T, N), tight, atol=1e-3, rtol=1e-3)
    assert jnp.allclose(out[0], ref, atol=2e-2, rtol=2e-2)
    print("KERNEL_OK")
</pallas_src>

<mosaic_0001>
module attributes {stable_mosaic.version = 11 : i64} {
  func.func @okriging_kernel(%arg0: i32, %arg1: i32, %arg2: memref<16x16xbf16, #tpu.memory_space<vmem>>, %arg3: memref<16x16xbf16, #tpu.memory_space<vmem>>, %arg4: memref<1x16xf32, #tpu.memory_space<vmem>>, %arg5: memref<16x16xf32, #tpu.memory_space<vmem>>) attributes {dimension_semantics = [#tpu.dimension_semantics<parallel>, #tpu.dimension_semantics<parallel>], iteration_bounds = array<i64: 1, 1>, scalar_prefetch = 0 : i64, scratch_operands = 0 : i64, tpu.core_type = #tpu.core_type<tc>, window_params = [{transform_indices = @transform_0, window_bounds = array<i64: 16, 16>}, {pipeline_mode = #tpu.pipeline_mode<synchronous>, transform_indices = @transform_1, window_bounds = array<i64: 16, 16>}, {transform_indices = @transform_2, window_bounds = array<i64: 1, 16>}, {transform_indices = @transform_3, window_bounds = array<i64: 16, 16>}]} {
    %c0 = arith.constant 0 : index
    %c0_0 = arith.constant 0 : index
    %0 = vector.load %arg2[%c0, %c0_0] : memref<16x16xbf16, #tpu.memory_space<vmem>>, vector<16x16xbf16>
    %c0_1 = arith.constant 0 : index
    %c0_2 = arith.constant 0 : index
    %1 = vector.load %arg3[%c0_1, %c0_2] : memref<16x16xbf16, #tpu.memory_space<vmem>>, vector<16x16xbf16>
    %cst = arith.constant dense<0.000000e+00> : vector<16x16xf32>
    %2 = tpu.matmul %0, %1, %cst {dimension_numbers = #tpu.dot_dimension_numbers<[1], [0], [0], [1], [0, 0, 1, 1], [], []>} : vector<16x16xbf16>, vector<16x16xbf16>, vector<16x16xf32> -> vector<16x16xf32>
    %c0_3 = arith.constant 0 : index
    %c0_4 = arith.constant 0 : index
    %3 = vector.load %arg4[%c0_3, %c0_4] : memref<1x16xf32, #tpu.memory_space<vmem>>, vector<1x16xf32>
    %4 = vector.broadcast %3 : vector<1x16xf32> to vector<16x16xf32>
    %5 = arith.mulf %2, %4 : vector<16x16xf32>
    %c0_5 = arith.constant 0 : index
    %c0_6 = arith.constant 0 : index
    %6 = vector.load %arg5[%c0_5, %c0_6] : memref<16x16xf32, #tpu.memory_space<vmem>>, vector<16x16xf32>
    tpu.vector_store %arg5[%c0_5, %c0_6], %5 {strides = array<i32>} : memref<16x16xf32, #tpu.memory_space<vmem>>, vector<16x16xf32>,
    return
  }
  func.func @transform_0(%arg0: i32, %arg1: i32) -> (i32, i32) {
    %c0_i32 = arith.constant 0 : i32
    %c0_i32_0 = arith.constant 0 : i32
    return %arg1, %c0_i32 : i32, i32
  }
  func.func @transform_1(%arg0: i32, %arg1: i32) -> (i32, i32) {
    %c0_i32 = arith.constant 0 : i32
    %c0_i32_0 = arith.constant 0 : i32
    return %c0_i32, %arg0 : i32, i32
  }
  func.func @transform_2(%arg0: i32, %arg1: i32) -> (i32, i32) {
    %c0_i32 = arith.constant 0 : i32
    %c0_i32_0 = arith.constant 0 : i32
    return %c0_i32, %arg0 : i32, i32
  }
  func.func @transform_3(%arg0: i32, %arg1: i32) -> (i32, i32) {
    %c0_i32 = arith.constant 0 : i32
    return %arg1, %arg0 : i32, i32
  }
}

module attributes {stable_mosaic.version = 11 : i64} {
  func.func @okriging_kernel(%arg0: i32, %arg1: i32, %arg2: memref<16x16xbf16, #tpu.memory_space<vmem>>, %arg3: memref<16x16xbf16, #tpu.memory_space<vmem>>, %arg4: memref<1x16xf32, #tpu.memory_space<vmem>>, %arg5: memref<16x16xf32, #tpu.memory_space<vmem>>) attributes {dimension_semantics = [#tpu.dimension_semantics<parallel>, #tpu.dimension_semantics<parallel>], iteration_bounds = array<i64: 1, 1>, scalar_prefetch = 0 : i64, scratch_operands = 0 : i64, tpu.core_type = #tpu.core_type<tc>, window_params = [{transform_indices = @transform_0, window_bounds = array<i64: 16, 16>}, {transform_indices = @transform_1, window_bounds = array<i64: 16, 16>}, {transform_indices = @transform_2, window_bounds = array<i64: 1, 16>}, {transform_indices = @transform_3, window_bounds = array<i64: 16, 16>}]} {
    %c0 = arith.constant 0 : index
    %c0_0 = arith.constant 0 : index
    %0 = vector.load %arg2[%c0, %c0_0] : memref<16x16xbf16, #tpu.memory_space<vmem>>, vector<16x16xbf16>
    %c0_1 = arith.constant 0 : index
    %c0_2 = arith.constant 0 : index
    %1 = vector.load %arg3[%c0_1, %c0_2] : memref<16x16xbf16, #tpu.memory_space<vmem>>, vector<16x16xbf16>
    %cst = arith.constant dense<0.000000e+00> : vector<16x16xf32>
    %2 = tpu.matmul %0, %1, %cst {dimension_numbers = #tpu.dot_dimension_numbers<[1], [0], [0], [1], [0, 0, 1, 1], [], []>} : vector<16x16xbf16>, vector<16x16xbf16>, vector<16x16xf32> -> vector<16x16xf32>
    %c0_3 = arith.constant 0 : index
    %c0_4 = arith.constant 0 : index
    %3 = vector.load %arg4[%c0_3, %c0_4] : memref<1x16xf32, #tpu.memory_space<vmem>>, vector<1x16xf32>
    %4 = vector.broadcast %3 : vector<1x16xf32> to vector<16x16xf32>
    %5 = arith.mulf %2, %4 : vector<16x16xf32>
    %c0_5 = arith.constant 0 : index
    %c0_6 = arith.constant 0 : index
    %6 = vector.load %arg5[%c0_5, %c0_6] : memref<16x16xf32, #tpu.memory_space<vmem>>, vector<16x16xf32>
    tpu.vector_store %arg5[%c0_5, %c0_6], %5 {strides = array<i32>} : memref<16x16xf32, #tpu.memory_space<vmem>>, vector<16x16xf32>,
    return
  }
  func.func @transform_0(%arg0: i32, %arg1: i32) -> (i32, i32) {
    %c0_i32 = arith.constant 0 : i32
    %c0_i32_0 = arith.constant 0 : i32
    return %arg1, %c0_i32 : i32, i32
  }
  func.func @transform_1(%arg0: i32, %arg1: i32) -> (i32, i32) {
    %c0_i32 = arith.constant 0 : i32
    %c0_i32_0 = arith.constant 0 : i32
    return %c0_i32, %arg0 : i32, i32
  }
  func.func @transform_2(%arg0: i32, %arg1: i32) -> (i32, i32) {
    %c0_i32 = arith.constant 0 : i32
    %c0_i32_0 = arith.constant 0 : i32
    return %c0_i32, %arg0 : i32, i32
  }
  func.func @transform_3(%arg0: i32, %arg1: i32) -> (i32, i32) {
    %c0_i32 = arith.constant 0 : i32
    return %arg1, %arg0 : i32, i32
  }
}

</mosaic_0001>

<bundles_post_ra>
// kernel: tpu_custom_call.1
= control target key start
LH: loop header
LB: loop body
LE: loop exit
PB: predicated region body
PF: predicated region fallthrough
CT: control target
= control target key end

     0   :  { %8 = vsyncpa [#allocation3], 0  ;;  %s296_s0 = inlined_call_operand.hbm [shape: bf16[16,16], index: 0, kind: input, shape index: {}]   ;;  %s297_s1 = inlined_call_operand.hbm [shape: bf16[16,16], index: 1, kind: input, shape index: {}]   ;;  %s298_s2 = inlined_call_operand.vmem [shape: f32[1,16], index: 2, kind: input, shape index: {}]   ;;  %s299_s3 = inlined_call_operand.hbm [shape: f32[16,16], index: 3, kind: output, shape index: {}]  }
   0x1   :  { %9 = vsyncpa [#allocation6], 0 }
   0x2   :  { %10 = vsyncpa [#allocation4], 0  ;;  %s228_s12 = smov [#allocation2]   ;;  %s156_s16 = scalar_lea.hbm %s296_s0, 128 }
   0x3   :  { %s16_s13 = sshll.u32 %s228_s12, 4  ;;  %p157_p0 = scmp.ne.s32.totalorder %s296_s0, %s156_s16  ;;  %s17_s13 = int_to_ptr.vmem [resolvable:$true] %s16_s13 }
   0x4   :  { %p160_p1 = scmp.lt.u32.totalorder %s156_s16, %s296_s0 }
   0x6   :  { %p162_p2 = pnand %p160_p1, %p157_p0 }
   0x8   :  { %165 = shalt.err (!%p162_p2)
}
   0x9   :  { %s166_s21 = scalar_lea.vmem %s17_s13, 128  ;;  %p171_p4 = scmp.lt.s32.totalorder %s17_s13, %s17_s13 }
   0xa   :  { %p167_p3 = scmp.ne.s32.totalorder %s17_s13, %s166_s21  ;;  %p172_p5 = scmp.lt.s32.totalorder %s166_s21, %s166_s21 }
   0xc   :  { %p173_p6 = por %p172_p5, %p171_p4 }
   0xe   :  { %p174_p7 = pnand %p173_p6, %p167_p3 }
  0x10   :  { %177 = shalt.err (!%p174_p7)
}
  0x11   :  { %s229_s22 = smov 64   ;;  %s230_s23 = smov 4  }
  0x12   :  { %22 = dma.hbm_to_vmem [thread:$0]  %s296_s0, 128, %s17_s13, [#allocation3], %s229_s22, %s229_s22, %s230_s23  }
  0x13   :  { %s231_s26 = smov [#allocation5]   ;;  %s178_s30 = scalar_lea.hbm %s297_s1, 128 }
  0x14   :  { %s28_s27 = sshll.u32 %s231_s26, 4  ;;  %p179_p8 = scmp.ne.s32.totalorder %s297_s1, %s178_s30  ;;  %s29_s27 = int_to_ptr.vmem [resolvable:$true] %s28_s27 }
  0x15   :  { %p182_p9 = scmp.lt.u32.totalorder %s178_s30, %s297_s1 }
  0x17   :  { %p184_p10 = pnand %p182_p9, %p179_p8 }
  0x19   :  { %187 = shalt.err (!%p184_p10)
}
  0x1a   :  { %s188_s8 = scalar_lea.vmem %s29_s27, 128  ;;  %p193_p12 = scmp.lt.s32.totalorder %s29_s27, %s29_s27 }
  0x1b   :  { %p189_p11 = scmp.ne.s32.totalorder %s29_s27, %s188_s8  ;;  %p194_p13 = scmp.lt.s32.totalorder %s188_s8, %s188_s8 }
  0x1d   :  { %p195_p0 = por %p194_p13, %p193_p12 }
  0x1f   :  { %p196_p1 = pnand %p195_p0, %p189_p11 }
  0x21   :  { %199 = shalt.err (!%p196_p1)
}
  0x22   :  { %34 = dma.hbm_to_vmem [thread:$0]  %s297_s1, 128, %s29_s27, [#allocation6], %s229_s22, %s229_s22, %s230_s23  }
  0x23   :  { %222 = dma.done.wait [#allocation3], 128  }
  0x24   :  { %223 = vsyncadd [#allocation3], 4294967168 }
  0x25   :  { %224 = dma.done.wait [#allocation6], 128  }
  0x26   :  { %225 = vsyncadd [#allocation6], 4294967168  ;;  %v232_v0 = vmov 0.0   ;;  %vm233_vm0 = vmmov 0   ;;  %v154_v1 = vld [vmem:[#allocation5] sm:$0xff]   ;;  %v155_v2 = vld [vmem:[#allocation2] sm:$0xff]  }
  0x27   :  { %139 = vmatprep.subr.bf16.mxu0 %v232_v0  ;;  %141 = vmatprep.mubr.msk.bf16.mxu0 %vm233_vm0, %v232_v0  ;;  %vm59_vm1 = vcmask 130048   ;;  %v136_v3 = vld [vmem:[%s298_s2] ss:$0 sm:$0xff]  ;;  %s234_s12 = smov [#allocation7]  }
  0x28   :  { %140 = vmatpush3.bf16.msra.mxu0 %v154_v1  ;;  %s120_s13 = sshll.u32 %s234_s12, 4  ;;  %s121_s13 = int_to_ptr.vmem [resolvable:$true] %s120_s13 }
  0x29   :  { %s200_s1 = scalar_lea.vmem %s121_s13, 256  ;;  %p205_p3 = scmp.lt.s32.totalorder %s121_s13, %s121_s13 }
  0x2a   :  { %p201_p2 = scmp.ne.s32.totalorder %s121_s13, %s200_s1  ;;  %p206_p4 = scmp.lt.s32.totalorder %s200_s1, %s200_s1 }
  0x2b   :  { %142 = vmatmul.mubr.msk.bf16.vlgmr.msra.gmra.mrb[0].mxu0 %vm59_vm1, %v155_v2 }
  0x2c   :  { %p207_p5 = por %p206_p4, %p205_p3 }
  0x2e   :  { %p208_p6 = pnand %p207_p5, %p201_p2 }
  0xfe   :  { %v97_v4 = vpop.f32.mrb[0].mxu0 }
  0xff   :  { %v111_v5 = vmul.f32 %v136_v3, %v97_v4  ;;  %v143_v6 = vpop.f32.mrb[1].mxu0 }
 0x100   :  { %v100_v7 = vpop.f32.mrb[2].mxu0 }
 0x101   :  { %113 = vst.msk [vmem:[#allocation7] sm:$0xff] %vm59_vm1, %v111_v5  ;;  %v112_v8 = vmul.f32 %v136_v3, %v100_v7  ;;  %v144_v9 = vpop.f32.mrb[3].mxu0 }
 0x103   :  { %114 = vst.msk [vmem:[#allocation7 + $0x8] sm:$0xff] %vm59_vm1, %v112_v8 }
 0x104   :  { %211 = shalt.err (!%p208_p6)
}
 0x105   :  { %s212_s15 = scalar_lea.hbm %s299_s3, 256 }
 0x106   :  { %p213_p7 = scmp.ne.s32.totalorder %s299_s3, %s212_s15  ;;  %p216_p8 = scmp.lt.u32.totalorder %s212_s15, %s299_s3 }
 0x108   :  { %p218_p9 = pnand %p216_p8, %p213_p7 }
 0x10a   :  { %221 = shalt.err (!%p218_p9)
}
 0x10b   :  { %s235_s20 = smov 128   ;;  %s236_s21 = smov 8  }
 0x10c   :  { %126 = dma.vmem_to_hbm [thread:$0]  %s121_s13, 256, %s299_s3, [#allocation4], %s235_s20, %s235_s20, %s236_s21  }
 0x10d   :  { %226 = dma.done.wait [#allocation4], 256  }
 0x10e   :  { %227 = vsyncadd [#allocation4], 4294967040 }
 0x10f   :  { %130 = vsyncpa [#allocation3], 1 }
 0x110   :  { %131 = vsyncpa [#allocation6], 1 }
 0x111   :  { %132 = vsyncpa [#allocation4], 1 }

// kernel: tpu_custom_call.1
= control target key start
LH: loop header
LB: loop body
LE: loop exit
PB: predicated region body
PF: predicated region fallthrough
CT: control target
= control target key end

     0   :  { %8 = vsyncpa [#allocation3], 0  ;;  %s296_s0 = inlined_call_operand.hbm [shape: bf16[16,16], index: 0, kind: input, shape index: {}]   ;;  %s297_s1 = inlined_call_operand.hbm [shape: bf16[16,16], index: 1, kind: input, shape index: {}]   ;;  %s298_s2 = inlined_call_operand.vmem [shape: f32[1,16], index: 2, kind: input, shape index: {}]   ;;  %s299_s3 = inlined_call_operand.hbm [shape: f32[16,16], index: 3, kind: output, shape index: {}]  }
   0x1   :  { %9 = vsyncpa [#allocation6], 0 }
   0x2   :  { %10 = vsyncpa [#allocation4], 0  ;;  %s228_s12 = smov [#allocation2]   ;;  %s156_s16 = scalar_lea.hbm %s296_s0, 128 }
   0x3   :  { %s16_s13 = sshll.u32 %s228_s12, 4  ;;  %p157_p0 = scmp.ne.s32.totalorder %s296_s0, %s156_s16  ;;  %s17_s13 = int_to_ptr.vmem [resolvable:$true] %s16_s13 }
   0x4   :  { %p160_p1 = scmp.lt.u32.totalorder %s156_s16, %s296_s0 }
   0x6   :  { %p162_p2 = pnand %p160_p1, %p157_p0 }
   0x8   :  { %165 = shalt.err (!%p162_p2)
}
   0x9   :  { %s166_s21 = scalar_lea.vmem %s17_s13, 128  ;;  %p171_p4 = scmp.lt.s32.totalorder %s17_s13, %s17_s13 }
   0xa   :  { %p167_p3 = scmp.ne.s32.totalorder %s17_s13, %s166_s21  ;;  %p172_p5 = scmp.lt.s32.totalorder %s166_s21, %s166_s21 }
   0xc   :  { %p173_p6 = por %p172_p5, %p171_p4 }
   0xe   :  { %p174_p7 = pnand %p173_p6, %p167_p3 }
  0x10   :  { %177 = shalt.err (!%p174_p7)
}
  0x11   :  { %s229_s22 = smov 64   ;;  %s230_s23 = smov 4  }
  0x12   :  { %22 = dma.hbm_to_vmem [thread:$0]  %s296_s0, 128, %s17_s13, [#allocation3], %s229_s22, %s229_s22, %s230_s23  }
  0x13   :  { %s231_s26 = smov [#allocation5]   ;;  %s178_s30 = scalar_lea.hbm %s297_s1, 128 }
  0x14   :  { %s28_s27 = sshll.u32 %s231_s26, 4  ;;  %p179_p8 = scmp.ne.s32.totalorder %s297_s1, %s178_s30  ;;  %s29_s27 = int_to_ptr.vmem [resolvable:$true] %s28_s27 }
  0x15   :  { %p182_p9 = scmp.lt.u32.totalorder %s178_s30, %s297_s1 }
  0x17   :  { %p184_p10 = pnand %p182_p9, %p179_p8 }
  0x19   :  { %187 = shalt.err (!%p184_p10)
}
  0x1a   :  { %s188_s8 = scalar_lea.vmem %s29_s27, 128  ;;  %p193_p12 = scmp.lt.s32.totalorder %s29_s27, %s29_s27 }
  0x1b   :  { %p189_p11 = scmp.ne.s32.totalorder %s29_s27, %s188_s8  ;;  %p194_p13 = scmp.lt.s32.totalorder %s188_s8, %s188_s8 }
  0x1d   :  { %p195_p0 = por %p194_p13, %p193_p12 }
  0x1f   :  { %p196_p1 = pnand %p195_p0, %p189_p11 }
  0x21   :  { %199 = shalt.err (!%p196_p1)
}
  0x22   :  { %34 = dma.hbm_to_vmem [thread:$0]  %s297_s1, 128, %s29_s27, [#allocation6], %s229_s22, %s229_s22, %s230_s23  }
  0x23   :  { %222 = dma.done.wait [#allocation3], 128  }
  0x24   :  { %223 = vsyncadd [#allocation3], 4294967168 }
  0x25   :  { %224 = dma.done.wait [#allocation6], 128  }
  0x26   :  { %225 = vsyncadd [#allocation6], 4294967168  ;;  %v232_v0 = vmov 0.0   ;;  %vm233_vm0 = vmmov 0   ;;  %v154_v1 = vld [vmem:[#allocation5] sm:$0xff]   ;;  %v155_v2 = vld [vmem:[#allocation2] sm:$0xff]  }
  0x27   :  { %139 = vmatprep.subr.bf16.mxu0 %v232_v0  ;;  %141 = vmatprep.mubr.msk.bf16.mxu0 %vm233_vm0, %v232_v0  ;;  %vm59_vm1 = vcmask 130048   ;;  %v136_v3 = vld [vmem:[%s298_s2] ss:$0 sm:$0xff]  ;;  %s234_s12 = smov [#allocation7]  }
  0x28   :  { %140 = vmatpush3.bf16.msra.mxu0 %v154_v1  ;;  %s120_s13 = sshll.u32 %s234_s12, 4  ;;  %s121_s13 = int_to_ptr.vmem [resolvable:$true] %s120_s13 }
  0x29   :  { %s200_s1 = scalar_lea.vmem %s121_s13, 256  ;;  %p205_p3 = scmp.lt.s32.totalorder %s121_s13, %s121_s13 }
  0x2a   :  { %p201_p2 = scmp.ne.s32.totalorder %s121_s13, %s200_s1  ;;  %p206_p4 = scmp.lt.s32.totalorder %s200_s1, %s200_s1 }
  0x2b   :  { %142 = vmatmul.mubr.msk.bf16.vlgmr.msra.gmra.mrb[0].mxu0 %vm59_vm1, %v155_v2 }
  0x2c   :  { %p207_p5 = por %p206_p4, %p205_p3 }
  0x2e   :  { %p208_p6 = pnand %p207_p5, %p201_p2 }
  0xfe   :  { %v97_v4 = vpop.f32.mrb[0].mxu0 }
  0xff   :  { %v111_v5 = vmul.f32 %v136_v3, %v97_v4  ;;  %v143_v6 = vpop.f32.mrb[1].mxu0 }
 0x100   :  { %v100_v7 = vpop.f32.mrb[2].mxu0 }
 0x101   :  { %113 = vst.msk [vmem:[#allocation7] sm:$0xff] %vm59_vm1, %v111_v5  ;;  %v112_v8 = vmul.f32 %v136_v3, %v100_v7  ;;  %v144_v9 = vpop.f32.mrb[3].mxu0 }
 0x103   :  { %114 = vst.msk [vmem:[#allocation7 + $0x8] sm:$0xff] %vm59_vm1, %v112_v8 }
 0x104   :  { %211 = shalt.err (!%p208_p6)
}
 0x105   :  { %s212_s15 = scalar_lea.hbm %s299_s3, 256 }
 0x106   :  { %p213_p7 = scmp.ne.s32.totalorder %s299_s3, %s212_s15  ;;  %p216_p8 = scmp.lt.u32.totalorder %s212_s15, %s299_s3 }
 0x108   :  { %p218_p9 = pnand %p216_p8, %p213_p7 }
 0x10a   :  { %221 = shalt.err (!%p218_p9)
}
 0x10b   :  { %s235_s20 = smov 128   ;;  %s236_s21 = smov 8  }
 0x10c   :  { %126 = dma.vmem_to_hbm [thread:$0]  %s121_s13, 256, %s299_s3, [#allocation4], %s235_s20, %s235_s20, %s236_s21  }
 0x10d   :  { %226 = dma.done.wait [#allocation4], 256  }
 0x10e   :  { %227 = vsyncadd [#allocation4], 4294967040 }
 0x10f   :  { %130 = vsyncpa [#allocation3], 1 }
 0x110   :  { %131 = vsyncpa [#allocation6], 1 }
 0x111   :  { %132 = vsyncpa [#allocation4], 1 }

</bundles_post_ra>
